<compile_context>
chip_gen: v7x
topology: tpu7x:2x2x1
jax: 0.10.0
libtpu: 0.0.40
codegen_flags: <defaults>
</compile_context>

<pallas_src>
import functools

import jax
import jax.numpy as jnp
from jax.experimental import pallas as pl
from jax.experimental.pallas import tpu as pltpu

HIDDEN = 128          # layer_size in the PyTorch module
N_HIDDEN_LAYERS = 5   # five Linear+BN+ReLU blocks
BN_EPS = 1e-5
LANE = 128            # lane width (last-dim tile)
SUBLANE = 8           # f32 sublane tile
MAX_TB = 2048         # batch tile upper bound (review item 1)
VMEM_TILE_BUDGET = 24 << 20   # conservative tile-sizing budget, fits all generations
OUT_DTYPE = jnp.bfloat16      # lane-padded output stored bf16, upcast after slicing


def _round_up(n, m):
    return (n + m - 1) // m * m


def _cdiv(a, b):
    return -(-a // b)


def _elementwise_dtype():
    """bf16 bias-add/ReLU on chips with a bf16 VALU (v6e/v7x); f32 otherwise."""
    try:
        dev = jax.devices()[0]
        if dev.platform != "tpu":
            return jnp.float32
        kind = dev.device_kind.lower()
        if any(tag in kind for tag in ("v2", "v3", "v4", "v5")):
            return jnp.float32
        return jnp.bfloat16
    except Exception:  # pragma: no cover - conservative fallback
        return jnp.float32


_EW_DTYPE = _elementwise_dtype()


def dumlp_kernel(x_ref, w1_ref, wh_ref, bh_ref, wo_ref, bo_ref, o_ref):
    """One (TB, .) batch tile of the fused MLP.

    x_ref  : (TB, D_in)   f32 input tile
    w1_ref : (D_in, H)    bf16 first linear weight (BN-folded)
    wh_ref : (4, H, H)    bf16 hidden linear weights (BN-folded)
    bh_ref : (5, H)       f32  folded biases (linear bias + BN) for the 5 blocks
    wo_ref : (H, D_pad)   bf16 output weight, lane-padded
    bo_ref : (1, D_pad)   f32  output bias, lane-padded
    o_ref  : (TB, D_pad)  bf16 output tile
    """
    # Layer 1: Linear(D_in -> 128) [+ folded BN] + ReLU
    h = jnp.dot(x_ref[...].astype(jnp.bfloat16), w1_ref[...],
                preferred_element_type=jnp.float32)
    h = jnp.maximum(h.astype(_EW_DTYPE) + bh_ref[0].astype(_EW_DTYPE), 0.0)
    h = h.astype(jnp.bfloat16)

    # Layers 2..5: Linear(128 -> 128) [+ folded BN] + ReLU (static unroll)
    for i in range(N_HIDDEN_LAYERS - 1):
        h = jnp.dot(h, wh_ref[i], preferred_element_type=jnp.float32)
        h = jnp.maximum(h.astype(_EW_DTYPE) + bh_ref[i + 1].astype(_EW_DTYPE), 0.0)
        h = h.astype(jnp.bfloat16)

    # Output head: Linear(128 -> D_pad); bias-add in f32, store bf16.
    out = jnp.dot(h, wo_ref[...], preferred_element_type=jnp.float32) + bo_ref[0]
    o_ref[...] = out.astype(o_ref.dtype)


def prepare_params(params):
    """Fold eval-mode BatchNorm + bias into the weights and cast weights to bf16.

    y = (x@W + b - mean) * gamma*rsqrt(var+eps) + beta
      = x @ (W*scale) + (b*scale + beta - mean*scale)
    """
    scale = params["gamma"] * jax.lax.rsqrt(params["running_var"] + BN_EPS)   # (5, H)
    shift = params["beta"] - params["running_mean"] * scale                   # (5, H)

    w1 = (params["w1"] * scale[0][None, :]).astype(jnp.bfloat16)
    wh = (params["w_hidden"] * scale[1:][:, None, :]).astype(jnp.bfloat16)
    bh = (params["b_hidden"] * scale + shift).astype(jnp.float32)

    d_out = params["w_out"].shape[1]
    d_pad = _round_up(d_out, LANE)
    wo = jnp.zeros((HIDDEN, d_pad), jnp.float32).at[:, :d_out].set(params["w_out"])
    bo = jnp.zeros((1, d_pad), jnp.float32).at[:, :d_out].set(params["b_out"])
    return {"w1": w1, "wh": wh, "bh": bh,
            "wo": wo.astype(jnp.bfloat16), "bo": bo}


@functools.partial(jax.jit, static_argnames=("d_out",))
def dumlp_forward(x, prepped, *, d_out):
    B, d_in = x.shape
    d_pad = prepped["wo"].shape[1]
    out_isz = jnp.dtype(OUT_DTYPE).itemsize

    weight_bytes = sum(int(v.size) * v.dtype.itemsize for v in prepped.values())

    # --- Batch tile sizing from a VMEM budget (review items 1, 2, 5) ------------
    # Per row: double-buffered f32 input + double-buffered bf16 output tiles, plus
    # generous f32/bf16 activation scratch for the 128-wide hidden layers.
    per_row_bytes = 2 * d_in * 4 + 2 * d_pad * out_isz + 4 * HIDDEN * 4
    avail = VMEM_TILE_BUDGET - 2 * weight_bytes
    tb_cap = max(SUBLANE, min(MAX_TB, (max(avail, 0) // per_row_bytes)
                              // SUBLANE * SUBLANE))

    b_pad = _round_up(max(B, SUBLANE), SUBLANE)
    # Cap the tile at ceil(b_pad/2) so mid-size batches still yield >=2 grid steps
    # and v7x's two TensorCores both get work ("parallel" axis). Single minimal tile
    # batches (b_pad <= 8) naturally stay at one step.
    two_tile = _round_up(_cdiv(b_pad, 2), SUBLANE)
    tb = max(SUBLANE, min(tb_cap, two_tile))
    b_pad = _round_up(b_pad, tb)
    if b_pad != B:
        x = jnp.pad(x, ((0, b_pad - B), (0, 0)))

    grid = (b_pad // tb,)

    # Explicit VMEM limit sized to the chosen tile (+ headroom), clamped to a range
    # that is safe on v5e (128 MiB phys, 16 MiB default) and v7x (64 MiB phys).
    vmem_need = 2 * weight_bytes + tb * per_row_bytes + (2 << 20)
    vmem_limit = int(min(max(vmem_need, 16 << 20), 48 << 20))

    flops = 2 * b_pad * (d_in * HIDDEN
                         + (N_HIDDEN_LAYERS - 1) * HIDDEN * HIDDEN
                         + HIDDEN * d_pad)
    bytes_accessed = b_pad * (d_in * 4 + d_pad * out_isz) + weight_bytes

    out = pl.pallas_call(
        dumlp_kernel,
        out_shape=jax.ShapeDtypeStruct((b_pad, d_pad), OUT_DTYPE),
        grid_spec=pltpu.PrefetchScalarGridSpec(
            num_scalar_prefetch=0,
            grid=grid,
            in_specs=[
                pl.BlockSpec((tb, d_in), lambda i: (i, 0)),             # x: batch-tiled
                pl.BlockSpec(prepped["w1"].shape, lambda i: (0, 0)),    # weights resident
                pl.BlockSpec(prepped["wh"].shape, lambda i: (0, 0, 0)),
                pl.BlockSpec(prepped["bh"].shape, lambda i: (0, 0)),
                pl.BlockSpec(prepped["wo"].shape, lambda i: (0, 0)),
                pl.BlockSpec(prepped["bo"].shape, lambda i: (0, 0)),
            ],
            out_specs=pl.BlockSpec((tb, d_pad), lambda i: (i, 0)),
        ),
        compiler_params=pltpu.CompilerParams(
            dimension_semantics=("parallel",),   # shard batch tiles across TCs (v7x)
            vmem_limit_bytes=vmem_limit),
        cost_estimate=pl.CostEstimate(flops=flops, transcendentals=0,
                                      bytes_accessed=bytes_accessed),
    )(x, prepped["w1"], prepped["wh"], prepped["bh"],
      prepped["wo"], prepped["bo"])

    return out[:B, :d_out].astype(jnp.float32)


def init_params(key, input_dim, output_dim):
    """Deterministic synthetic parameters with PyTorch-like shapes.

    Linear weights are stored as (in_features, out_features), i.e. the transpose
    of PyTorch's (out, in), so the kernel can do x @ W directly.
    """
    ks = jax.random.split(key, 16)
    u = lambda k, shape, bound: jax.random.uniform(
        k, shape, jnp.float32, minval=-bound, maxval=bound)

    b1 = 1.0 / jnp.sqrt(input_dim)
    bh = 1.0 / jnp.sqrt(HIDDEN)

    params = {
        "w1": u(ks[0], (input_dim, HIDDEN), b1),
        "w_hidden": u(ks[1], (N_HIDDEN_LAYERS - 1, HIDDEN, HIDDEN), bh),
        "b_hidden": jnp.concatenate(
            [u(ks[2], (1, HIDDEN), b1), u(ks[3], (N_HIDDEN_LAYERS - 1, HIDDEN), bh)],
            axis=0),
        # BatchNorm1d affine params + running stats (eval mode uses running stats)
        "gamma": 1.0 + 0.1 * jax.random.normal(ks[4], (N_HIDDEN_LAYERS, HIDDEN)),
        "beta": 0.1 * jax.random.normal(ks[5], (N_HIDDEN_LAYERS, HIDDEN)),
        "running_mean": 0.1 * jax.random.normal(ks[6], (N_HIDDEN_LAYERS, HIDDEN)),
        "running_var": 1.0 + 0.1 * jax.random.uniform(ks[7], (N_HIDDEN_LAYERS, HIDDEN)),
        "w_out": u(ks[8], (HIDDEN, output_dim), bh),
        "b_out": u(ks[9], (1, output_dim), bh),
    }
    return params


def reference_forward(x, params):
    """Pure-JAX f32 reference (unfolded BN) for correctness checking."""
    h = x
    w_list = [params["w1"]] + [params["w_hidden"][i] for i in range(N_HIDDEN_LAYERS - 1)]
    for i in range(N_HIDDEN_LAYERS):
        h = h @ w_list[i] + params["b_hidden"][i]
        inv = 1.0 / jnp.sqrt(params["running_var"][i] + BN_EPS)
        h = (h - params["running_mean"][i]) * (params["gamma"][i] * inv) + params["beta"][i]
        h = jnp.maximum(h, 0.0)
    return h @ params["w_out"] + params["b_out"][0]


if __name__ == "__main__":
    key = jax.random.PRNGKey(0)
    k_x, k_p = jax.random.split(key)

    B, input_dim, output_dim = 8, 32, 16
    x = jax.random.normal(k_x, (B, input_dim), jnp.float32)
    params = init_params(k_p, input_dim, output_dim)
    prepped = prepare_params(params)

    out = dumlp_forward(x, prepped, d_out=output_dim)
    jax.block_until_ready(out)

    ref = reference_forward(x, params)
    assert out.shape == (B, output_dim), out.shape
    max_err = float(jnp.max(jnp.abs(out - ref)))
    # bf16 MXU operands + bf16 output storage vs the f32 reference -> loosened tolerance.
    assert jnp.allclose(out, ref, atol=5e-2, rtol=5e-2), max_err

    print("KERNEL_OK")
</pallas_src>

<mosaic_0001>
module attributes {stable_mosaic.version = 11 : i64} {
  func.func @dumlp_kernel(%arg0: i32, %arg1: memref<8x32xf32, #tpu.memory_space<vmem>>, %arg2: memref<32x128xbf16, #tpu.memory_space<vmem>>, %arg3: memref<4x128x128xbf16, #tpu.memory_space<vmem>>, %arg4: memref<5x128xf32, #tpu.memory_space<vmem>>, %arg5: memref<128x128xbf16, #tpu.memory_space<vmem>>, %arg6: memref<1x128xf32, #tpu.memory_space<vmem>>, %arg7: memref<8x128xbf16, #tpu.memory_space<vmem>>) attributes {dimension_semantics = [#tpu.dimension_semantics<parallel>], iteration_bounds = array<i64: 1>, scalar_prefetch = 0 : i64, scratch_operands = 0 : i64, tpu.core_type = #tpu.core_type<tc>, window_params = [{transform_indices = @transform_0, window_bounds = array<i64: 8, 32>}, {pipeline_mode = #tpu.pipeline_mode<synchronous>, transform_indices = @transform_1, window_bounds = array<i64: 32, 128>}, {pipeline_mode = #tpu.pipeline_mode<synchronous>, transform_indices = @transform_2, window_bounds = array<i64: 4, 128, 128>}, {pipeline_mode = #tpu.pipeline_mode<synchronous>, transform_indices = @transform_3, window_bounds = array<i64: 5, 128>}, {pipeline_mode = #tpu.pipeline_mode<synchronous>, transform_indices = @transform_4, window_bounds = array<i64: 128, 128>}, {pipeline_mode = #tpu.pipeline_mode<synchronous>, transform_indices = @transform_5, window_bounds = array<i64: 1, 128>}, {transform_indices = @transform_6, window_bounds = array<i64: 8, 128>}]} {
    %c0 = arith.constant 0 : index
    %c0_0 = arith.constant 0 : index
    %0 = vector.load %arg1[%c0, %c0_0] : memref<8x32xf32, #tpu.memory_space<vmem>>, vector<8x32xf32>
    %1 = arith.truncf %0 : vector<8x32xf32> to vector<8x32xbf16>
    %c0_1 = arith.constant 0 : index
    %c0_2 = arith.constant 0 : index
    %2 = vector.load %arg2[%c0_1, %c0_2] : memref<32x128xbf16, #tpu.memory_space<vmem>>, vector<32x128xbf16>
    %cst = arith.constant dense<0.000000e+00> : vector<8x128xf32>
    %3 = tpu.matmul %1, %2, %cst {dimension_numbers = #tpu.dot_dimension_numbers<[1], [0], [0], [1], [0, 0, 1, 1], [], []>} : vector<8x32xbf16>, vector<32x128xbf16>, vector<8x128xf32> -> vector<8x128xf32>
    %c0_3 = arith.constant 0 : index
    %c0_4 = arith.constant 0 : index
    %4 = vector.load %arg4[%c0_3, %c0_4] : memref<5x128xf32, #tpu.memory_space<vmem>>, vector<1x128xf32>
    %5 = vector.shape_cast %4 : vector<1x128xf32> to vector<128xf32>
    %6 = vector.shape_cast %5 : vector<128xf32> to vector<1x128xf32>
    %7 = vector.broadcast %6 : vector<1x128xf32> to vector<8x128xf32>
    %8 = arith.addf %3, %7 : vector<8x128xf32>
    %cst_5 = arith.constant 0.000000e+00 : f32
    %9 = vector.broadcast %cst_5 : f32 to vector<8x128xf32>
    %10 = arith.maximumf %8, %9 : vector<8x128xf32>
    %11 = arith.truncf %10 : vector<8x128xf32> to vector<8x128xbf16>
    %c0_6 = arith.constant 0 : index
    %c0_7 = arith.constant 0 : index
    %c0_8 = arith.constant 0 : index
    %12 = vector.load %arg3[%c0_6, %c0_7, %c0_8] : memref<4x128x128xbf16, #tpu.memory_space<vmem>>, vector<1x128x128xbf16>
    %13 = vector.shape_cast %12 : vector<1x128x128xbf16> to vector<128x128xbf16>
    %cst_9 = arith.constant dense<0.000000e+00> : vector<8x128xf32>
    %14 = tpu.matmul %11, %13, %cst_9 {dimension_numbers = #tpu.dot_dimension_numbers<[1], [0], [0], [1], [0, 0, 1, 1], [], []>} : vector<8x128xbf16>, vector<128x128xbf16>, vector<8x128xf32> -> vector<8x128xf32>
    %c1 = arith.constant 1 : index
    %c0_10 = arith.constant 0 : index
    %15 = vector.load %arg4[%c1, %c0_10] : memref<5x128xf32, #tpu.memory_space<vmem>>, vector<1x128xf32>
    %16 = vector.shape_cast %15 : vector<1x128xf32> to vector<128xf32>
    %17 = vector.shape_cast %16 : vector<128xf32> to vector<1x128xf32>
    %18 = vector.broadcast %17 : vector<1x128xf32> to vector<8x128xf32>
    %19 = arith.addf %14, %18 : vector<8x128xf32>
    %cst_11 = arith.constant 0.000000e+00 : f32
    %20 = vector.broadcast %cst_11 : f32 to vector<8x128xf32>
    %21 = arith.maximumf %19, %20 : vector<8x128xf32>
    %22 = arith.truncf %21 : vector<8x128xf32> to vector<8x128xbf16>
    %c1_12 = arith.constant 1 : index
    %c0_13 = arith.constant 0 : index
    %c0_14 = arith.constant 0 : index
    %23 = vector.load %arg3[%c1_12, %c0_13, %c0_14] : memref<4x128x128xbf16, #tpu.memory_space<vmem>>, vector<1x128x128xbf16>
    %24 = vector.shape_cast %23 : vector<1x128x128xbf16> to vector<128x128xbf16>
    %cst_15 = arith.constant dense<0.000000e+00> : vector<8x128xf32>
    %25 = tpu.matmul %22, %24, %cst_15 {dimension_numbers = #tpu.dot_dimension_numbers<[1], [0], [0], [1], [0, 0, 1, 1], [], []>} : vector<8x128xbf16>, vector<128x128xbf16>, vector<8x128xf32> -> vector<8x128xf32>
    %c2 = arith.constant 2 : index
    %c0_16 = arith.constant 0 : index
    %26 = vector.load %arg4[%c2, %c0_16] : memref<5x128xf32, #tpu.memory_space<vmem>>, vector<1x128xf32>
    %27 = vector.shape_cast %26 : vector<1x128xf32> to vector<128xf32>
    %28 = vector.shape_cast %27 : vector<128xf32> to vector<1x128xf32>
    %29 = vector.broadcast %28 : vector<1x128xf32> to vector<8x128xf32>
    %30 = arith.addf %25, %29 : vector<8x128xf32>
    %cst_17 = arith.constant 0.000000e+00 : f32
    %31 = vector.broadcast %cst_17 : f32 to vector<8x128xf32>
    %32 = arith.maximumf %30, %31 : vector<8x128xf32>
    %33 = arith.truncf %32 : vector<8x128xf32> to vector<8x128xbf16>
    %c2_18 = arith.constant 2 : index
    %c0_19 = arith.constant 0 : index
    %c0_20 = arith.constant 0 : index
    %34 = vector.load %arg3[%c2_18, %c0_19, %c0_20] : memref<4x128x128xbf16, #tpu.memory_space<vmem>>, vector<1x128x128xbf16>
    %35 = vector.shape_cast %34 : vector<1x128x128xbf16> to vector<128x128xbf16>
    %cst_21 = arith.constant dense<0.000000e+00> : vector<8x128xf32>
    %36 = tpu.matmul %33, %35, %cst_21 {dimension_numbers = #tpu.dot_dimension_numbers<[1], [0], [0], [1], [0, 0, 1, 1], [], []>} : vector<8x128xbf16>, vector<128x128xbf16>, vector<8x128xf32> -> vector<8x128xf32>
    %c3 = arith.constant 3 : index
    %c0_22 = arith.constant 0 : index
    %37 = vector.load %arg4[%c3, %c0_22] : memref<5x128xf32, #tpu.memory_space<vmem>>, vector<1x128xf32>
    %38 = vector.shape_cast %37 : vector<1x128xf32> to vector<128xf32>
    %39 = vector.shape_cast %38 : vector<128xf32> to vector<1x128xf32>
    %40 = vector.broadcast %39 : vector<1x128xf32> to vector<8x128xf32>
    %41 = arith.addf %36, %40 : vector<8x128xf32>
    %cst_23 = arith.constant 0.000000e+00 : f32
    %42 = vector.broadcast %cst_23 : f32 to vector<8x128xf32>
    %43 = arith.maximumf %41, %42 : vector<8x128xf32>
    %44 = arith.truncf %43 : vector<8x128xf32> to vector<8x128xbf16>
    %c3_24 = arith.constant 3 : index
    %c0_25 = arith.constant 0 : index
    %c0_26 = arith.constant 0 : index
    %45 = vector.load %arg3[%c3_24, %c0_25, %c0_26] : memref<4x128x128xbf16, #tpu.memory_space<vmem>>, vector<1x128x128xbf16>
    %46 = vector.shape_cast %45 : vector<1x128x128xbf16> to vector<128x128xbf16>
    %cst_27 = arith.constant dense<0.000000e+00> : vector<8x128xf32>
    %47 = tpu.matmul %44, %46, %cst_27 {dimension_numbers = #tpu.dot_dimension_numbers<[1], [0], [0], [1], [0, 0, 1, 1], [], []>} : vector<8x128xbf16>, vector<128x128xbf16>, vector<8x128xf32> -> vector<8x128xf32>
    %c4 = arith.constant 4 : index
    %c0_28 = arith.constant 0 : index
    %48 = vector.load %arg4[%c4, %c0_28] : memref<5x128xf32, #tpu.memory_space<vmem>>, vector<1x128xf32>
    %49 = vector.shape_cast %48 : vector<1x128xf32> to vector<128xf32>
    %50 = vector.shape_cast %49 : vector<128xf32> to vector<1x128xf32>
    %51 = vector.broadcast %50 : vector<1x128xf32> to vector<8x128xf32>
    %52 = arith.addf %47, %51 : vector<8x128xf32>
    %cst_29 = arith.constant 0.000000e+00 : f32
    %53 = vector.broadcast %cst_29 : f32 to vector<8x128xf32>
    %54 = arith.maximumf %52, %53 : vector<8x128xf32>
    %55 = arith.truncf %54 : vector<8x128xf32> to vector<8x128xbf16>
    %c0_30 = arith.constant 0 : index
    %c0_31 = arith.constant 0 : index
    %56 = vector.load %arg5[%c0_30, %c0_31] : memref<128x128xbf16, #tpu.memory_space<vmem>>, vector<128x128xbf16>
    %cst_32 = arith.constant dense<0.000000e+00> : vector<8x128xf32>
    %57 = tpu.matmul %55, %56, %cst_32 {dimension_numbers = #tpu.dot_dimension_numbers<[1], [0], [0], [1], [0, 0, 1, 1], [], []>} : vector<8x128xbf16>, vector<128x128xbf16>, vector<8x128xf32> -> vector<8x128xf32>
    %c0_33 = arith.constant 0 : index
    %c0_34 = arith.constant 0 : index
    %58 = vector.load %arg6[%c0_33, %c0_34] : memref<1x128xf32, #tpu.memory_space<vmem>>, vector<1x128xf32>
    %59 = vector.shape_cast %58 : vector<1x128xf32> to vector<128xf32>
    %60 = vector.shape_cast %59 : vector<128xf32> to vector<1x128xf32>
    %61 = vector.broadcast %60 : vector<1x128xf32> to vector<8x128xf32>
    %62 = arith.addf %57, %61 : vector<8x128xf32>
    %63 = arith.truncf %62 : vector<8x128xf32> to vector<8x128xbf16>
    %c0_35 = arith.constant 0 : index
    %c0_36 = arith.constant 0 : index
    %64 = vector.load %arg7[%c0_35, %c0_36] : memref<8x128xbf16, #tpu.memory_space<vmem>>, vector<8x128xbf16>
    tpu.vector_store %arg7[%c0_35, %c0_36], %63 {strides = array<i32>} : memref<8x128xbf16, #tpu.memory_space<vmem>>, vector<8x128xbf16>,
    return
  }
  func.func @transform_0(%arg0: i32) -> (i32, i32) {
    %c0_i32 = arith.constant 0 : i32
    %c0_i32_0 = arith.constant 0 : i32
    return %arg0, %c0_i32 : i32, i32
  }
  func.func @transform_1(%arg0: i32) -> (i32, i32) {
    %c0_i32 = arith.constant 0 : i32
    %c0_i32_0 = arith.constant 0 : i32
    %c0_i32_1 = arith.constant 0 : i32
    return %c0_i32, %c0_i32_0 : i32, i32
  }
  func.func @transform_2(%arg0: i32) -> (i32, i32, i32) {
    %c0_i32 = arith.constant 0 : i32
    %c0_i32_0 = arith.constant 0 : i32
    %c0_i32_1 = arith.constant 0 : i32
    %c0_i32_2 = arith.constant 0 : i32
    return %c0_i32, %c0_i32_0, %c0_i32_1 : i32, i32, i32
  }
  func.func @transform_3(%arg0: i32) -> (i32, i32) {
    %c0_i32 = arith.constant 0 : i32
    %c0_i32_0 = arith.constant 0 : i32
    %c0_i32_1 = arith.constant 0 : i32
    return %c0_i32, %c0_i32_0 : i32, i32
  }
  func.func @transform_4(%arg0: i32) -> (i32, i32) {
    %c0_i32 = arith.constant 0 : i32
    %c0_i32_0 = arith.constant 0 : i32
    %c0_i32_1 = arith.constant 0 : i32
    return %c0_i32, %c0_i32_0 : i32, i32
  }
  func.func @transform_5(%arg0: i32) -> (i32, i32) {
    %c0_i32 = arith.constant 0 : i32
    %c0_i32_0 = arith.constant 0 : i32
    %c0_i32_1 = arith.constant 0 : i32
    return %c0_i32, %c0_i32_0 : i32, i32
  }
  func.func @transform_6(%arg0: i32) -> (i32, i32) {
    %c0_i32 = arith.constant 0 : i32
    %c0_i32_0 = arith.constant 0 : i32
    return %arg0, %c0_i32 : i32, i32
  }
}

</mosaic_0001>

<bundles_post_ra>
// kernel: dumlp_forward.1
= control target key start
LH: loop header
LB: loop body
LE: loop exit
PB: predicated region body
PF: predicated region fallthrough
CT: control target
= control target key end

     0   :  { %11 = vsyncpa [#allocation3], 0  ;;  %s1269_s0 = inlined_call_operand.hbm [shape: f32[8,32], index: 0, kind: input, shape index: {}]   ;;  %s1270_s1 = inlined_call_operand.hbm [shape: bf16[32,128], index: 1, kind: input, shape index: {}]   ;;  %s1271_s2 = inlined_call_operand.hbm [shape: bf16[4,128,128], index: 2, kind: input, shape index: {}]   ;;  %s1272_s3 = inlined_call_operand.hbm [shape: f32[5,128], index: 3, kind: input, shape index: {}]   ;;  %s1273_s4 = inlined_call_operand.hbm [shape: bf16[128,128], index: 4, kind: input, shape index: {}]   ;;  %s1274_s5 = inlined_call_operand.vmem [shape: f32[1,128], index: 5, kind: input, shape index: {}]   ;;  %s1275_s6 = inlined_call_operand.vmem [shape: bf16[8,128], index: 6, kind: output, shape index: {}]  }
   0x1   :  { %12 = vsyncpa [#allocation5], 0 }
   0x2   :  { %13 = vsyncpa [#allocation8], 0  ;;  %s1096_s21 = smov [#allocation4]   ;;  %s980_s25 = scalar_lea.hbm %s1270_s1, 256 }
   0x3   :  { %s29_s22 = sshll.u32 %s1096_s21, 4  ;;  %p981_p0 = scmp.ne.s32.totalorder %s1270_s1, %s980_s25  ;;  %s30_s22 = int_to_ptr.vmem [resolvable:$true] %s29_s22 }
   0x4   :  { %p984_p1 = scmp.lt.u32.totalorder %s980_s25, %s1270_s1 }
   0x6   :  { %p986_p2 = pnand %p984_p1, %p981_p0 }
   0x8   :  { %989 = shalt.err (!%p986_p2)
}
   0x9   :  { %s990_s30 = scalar_lea.vmem %s30_s22, 256  ;;  %p995_p4 = scmp.lt.s32.totalorder %s30_s22, %s30_s22 }
   0xa   :  { %p991_p3 = scmp.ne.s32.totalorder %s30_s22, %s990_s30  ;;  %p996_p5 = scmp.lt.s32.totalorder %s990_s30, %s990_s30 }
   0xc   :  { %p997_p6 = por %p996_p5, %p995_p4 }
   0xe   :  { %p998_p7 = pnand %p997_p6, %p991_p3 }
  0x10   :  { %1001 = shalt.err (!%p998_p7)
}
  0x11   :  { %s1097_s7 = smov 64   ;;  %s1098_s8 = smov 4  }
  0x12   :  { %35 = dma.hbm_to_vmem [thread:$0]  %s1270_s1, 256, %s30_s22, [#allocation5], %s1097_s7, %s1097_s7, %s1098_s8  }
  0x13   :  { %s1099_s11 = smov [#allocation7]   ;;  %s1100_s13 = smov [#allocation2]  }
  0x14   :  { %s54_s12 = sshll.u32 %s1099_s11, 4  ;;  %s20_s14 = sshll.u32 %s1100_s13, 4  ;;  %s55_s12 = int_to_ptr.vmem [resolvable:$true] %s54_s12  ;;  %s21_s14 = int_to_ptr.vmem [resolvable:$true] %s20_s14 }
  0x15   :  { %s1002_s17 = scalar_lea.hbm %s1272_s3, 128 }
  0x16   :  { %p1003_p8 = scmp.ne.s32.totalorder %s1272_s3, %s1002_s17  ;;  %p1006_p9 = scmp.lt.u32.totalorder %s1002_s17, %s1272_s3 }
  0x18   :  { %p1008_p10 = pnand %p1006_p9, %p1003_p8 }
  0x1a   :  { %1011 = shalt.err (!%p1008_p10)
}
  0x1b   :  { %s1012_s1 = scalar_lea.vmem %s55_s12, 128  ;;  %p1017_p12 = scmp.lt.s32.totalorder %s55_s12, %s55_s12 }
  0x1c   :  { %p1013_p11 = scmp.ne.s32.totalorder %s55_s12, %s1012_s1  ;;  %p1018_p13 = scmp.lt.s32.totalorder %s1012_s1, %s1012_s1 }
  0x1e   :  { %p1019_p0 = por %p1018_p13, %p1017_p12 }
  0x20   :  { %p1020_p1 = pnand %p1019_p0, %p1013_p11 }
  0x22   :  { %1023 = shalt.err (!%p1020_p1)
}
  0x23   :  { %57 = dma.hbm_to_vmem [thread:$0]  %s1272_s3, 128, %s55_s12, [#allocation8]  }
  0x24   :  { %s1024_s26 = scalar_lea.hbm %s1269_s0, 128 }
  0x25   :  { %p1025_p2 = scmp.ne.s32.totalorder %s1269_s0, %s1024_s26  ;;  %p1028_p3 = scmp.lt.u32.totalorder %s1024_s26, %s1269_s0 }
  0x27   :  { %p1030_p4 = pnand %p1028_p3, %p1025_p2 }
  0x29   :  { %1033 = shalt.err (!%p1030_p4)
}
  0x2a   :  { %s1034_s9 = scalar_lea.vmem %s21_s14, 128  ;;  %p1039_p6 = scmp.lt.s32.totalorder %s21_s14, %s21_s14 }
  0x2b   :  { %p1035_p5 = scmp.ne.s32.totalorder %s21_s14, %s1034_s9  ;;  %p1040_p7 = scmp.lt.s32.totalorder %s1034_s9, %s1034_s9 }
  0x2d   :  { %p1041_p8 = por %p1040_p7, %p1039_p6 }
  0x2f   :  { %p1042_p9 = pnand %p1041_p8, %p1035_p5 }
  0x31   :  { %1045 = shalt.err (!%p1042_p9)
}
  0x32   :  { %23 = dma.hbm_to_vmem [thread:$0]  %s1269_s0, 128, %s21_s14, [#allocation3]  }
  0x33   :  { %s1101_s11 = smov [#allocation6]   ;;  %s1102_s13 = smov [#allocation9]  }
  0x34   :  { %s41_s12 = sshll.u32 %s1101_s11, 4  ;;  %s63_s15 = sshll.u32 %s1102_s13, 4  ;;  %s42_s12 = int_to_ptr.vmem [resolvable:$true] %s41_s12  ;;  %s64_s15 = int_to_ptr.vmem [resolvable:$true] %s63_s15 }
  0x35   :  { %s1046_s18 = scalar_lea.hbm %s1271_s2, 4096 }
  0x36   :  { %p1047_p10 = scmp.ne.s32.totalorder %s1271_s2, %s1046_s18  ;;  %p1050_p11 = scmp.lt.u32.totalorder %s1046_s18, %s1271_s2 }
  0x38   :  { %p1052_p12 = pnand %p1050_p11, %p1047_p10 }
  0x3a   :  { %1055 = shalt.err (!%p1052_p12)
}
  0x3b   :  { %s1056_s0 = scalar_lea.vmem %s42_s12, 4096  ;;  %p1061_p0 = scmp.lt.s32.totalorder %s42_s12, %s42_s12 }
  0x3c   :  { %p1057_p13 = scmp.ne.s32.totalorder %s42_s12, %s1056_s0  ;;  %p1062_p1 = scmp.lt.s32.totalorder %s1056_s0, %s1056_s0 }
  0x3e   :  { %p1063_p2 = por %p1062_p1, %p1061_p0 }
  0x40   :  { %p1064_p3 = pnand %p1063_p2, %p1057_p13 }
  0x42   :  { %1067 = shalt.err (!%p1064_p3)
}
  0x43   :  { %47 = dma.hbm_to_vmem [thread:$0]  %s1271_s2, 4096, %s42_s12, [#allocation5], %s1097_s7, %s1097_s7, %s1098_s8  }
  0x44   :  { %s1068_s25 = scalar_lea.hbm %s1273_s4, 1024 }
  0x45   :  { %p1069_p4 = scmp.ne.s32.totalorder %s1273_s4, %s1068_s25  ;;  %p1072_p5 = scmp.lt.u32.totalorder %s1068_s25, %s1273_s4 }
  0x47   :  { %p1074_p6 = pnand %p1072_p5, %p1069_p4 }
  0x49   :  { %1077 = shalt.err (!%p1074_p6)
}
  0x4a   :  { %s1078_s30 = scalar_lea.vmem %s64_s15, 1024  ;;  %p1083_p8 = scmp.lt.s32.totalorder %s64_s15, %s64_s15 }
  0x4b   :  { %p1079_p7 = scmp.ne.s32.totalorder %s64_s15, %s1078_s30  ;;  %p1084_p9 = scmp.lt.s32.totalorder %s1078_s30, %s1078_s30 }
  0x4d   :  { %p1085_p10 = por %p1084_p9, %p1083_p8 }
  0x4f   :  { %p1086_p11 = pnand %p1085_p10, %p1079_p7 }
  0x51   :  { %1089 = shalt.err (!%p1086_p11)
}
  0x52   :  { %69 = dma.hbm_to_vmem [thread:$0]  %s1273_s4, 1024, %s64_s15, [#allocation8], %s1097_s7, %s1097_s7, %s1098_s8  }
  0x53   :  { %1090 = dma.done.wait [#allocation3], 128  }
  0x54   :  { %1091 = vsyncadd [#allocation3], 4294967168 }
  0x55   :  { %1092 = dma.done.wait [#allocation5], 4352  }
  0x56   :  { %1093 = vsyncadd [#allocation5], 4294962944 }
  0x57   :  { %1094 = dma.done.wait [#allocation8], 1152  }
  0x58   :  { %1095 = vsyncadd [#allocation8], 4294966144  ;;  %v1103_v0 = vmov 0.0   ;;  %vm1104_vm0 = vmmov 0   ;;  %v938_v1 = vld [vmem:[#allocation4] sm:$0xff]   ;;  %v939_v2 = vld [vmem:[#allocation4 + $0x8] sm:$0xff]  }
  0x59   :  { %821 = vmatprep.subr.bf16.mxu0 %v1103_v0  ;;  %825 = vmatprep.mubr.msk.bf16.mxu0 %vm1104_vm0, %v1103_v0  ;;  %v88_v3 = vld [vmem:[#allocation2] sm:$0xff]  ;;  %v940_v4 = vld [vmem:[#allocation6] sm:$0xff]   ;;  %vm111_vm1 = vcmask 261120   ;;  %v942_v7 = vld [vmem:[#allocation6 + $0x10] sm:$0xff]  }
  0x5a   :  { %829 = vmatprep.subr.bf16.mxu1 %v1103_v0  ;;  %845 = vmatprep.mubr.msk.bf16.mxu1 %vm1104_vm0, %v1103_v0  ;;  %v89_v5 = vpack.c.bf16 %v88_v3, %v88_v3  ;;  %v941_v6 = vld [vmem:[#allocation6 + $0x8] sm:$0xff]   ;;  %v943_v8 = vld [vmem:[#allocation6 + $0x18] sm:$0xff]   ;;  %v944_v9 = vld [vmem:[#allocation6 + $0x20] sm:$0xff]  }
  0x5b   :  { %822 = vmatpush3.bf16.msra.mxu0 %v938_v1  ;;  %830 = vmatpush3.bf16.msra.mxu1 %v940_v4  ;;  %v945_v10 = vld [vmem:[#allocation6 + $0x28] sm:$0xff]   ;;  %v946_v11 = vld [vmem:[#allocation6 + $0x30] sm:$0xff]   ;;  %v947_v12 = vld [vmem:[#allocation6 + $0x38] sm:$0xff]  }
  0x5c   :  { %823 = vmatprep.subr.bf16.mxu0 %v1103_v0  ;;  %831 = vmatprep.subr.bf16.mxu1 %v1103_v0  ;;  %v948_v13 = vld [vmem:[#allocation6 + $0x40] sm:$0xff]   ;;  %v949_v14 = vld [vmem:[#allocation6 + $0x48] sm:$0xff]   ;;  %v950_v15 = vld [vmem:[#allocation6 + $0x50] sm:$0xff]  }
  0x5d   :  { %v951_v16 = vld [vmem:[#allocation6 + $0x58] sm:$0xff]   ;;  %v952_v17 = vld [vmem:[#allocation6 + $0x60] sm:$0xff]   ;;  %v953_v18 = vld [vmem:[#allocation6 + $0x68] sm:$0xff]  }
  0x5e   :  { %v724_v19 = vld [vmem:[#allocation7] ss:$0 sm:$0xff]  ;;  %v954_v27 = vld [vmem:[#allocation6 + $0x70] sm:$0xff]   ;;  %v955_v28 = vld [vmem:[#allocation6 + $0x78] sm:$0xff]  }
  0x5f   :  { %824 = vmatpush3.bf16.msra.mxu0 %v939_v2  ;;  %832 = vmatpush3.bf16.msra.mxu1 %v941_v6  ;;  %v956_v29 = vld [vmem:[#allocation6 + $0x80] sm:$0xff]   ;;  %v957_v30 = vld [vmem:[#allocation6 + $0x88] sm:$0xff]   ;;  %v958_v31 = vld [vmem:[#allocation6 + $0x90] sm:$0xff]  }
  0x60   :  { %849 = vmatprep.subr.bf16.mxu0 %v1103_v0  ;;  %833 = vmatprep.subr.bf16.mxu1 %v1103_v0  ;;  %v959_v32 = vld [vmem:[#allocation6 + $0x98] sm:$0xff]   ;;  %v960_v33 = vld [vmem:[#allocation6 + $0xa0] sm:$0xff]   ;;  %v961_v34 = vld [vmem:[#allocation6 + $0xa8] sm:$0xff]  }
  0x61   :  { %v728_v35 = vld [vmem:[#allocation7 + $0x1] ss:$0 sm:$0xff]  ;;  %v962_v43 = vld [vmem:[#allocation6 + $0xb0] sm:$0xff]   ;;  %v963_v44 = vld [vmem:[#allocation6 + $0xb8] sm:$0xff]  }
  0x62   :  { %826 = vmatmul.mubr.msk.bf16.vlgmr.msra.gmra.mrb[0].mxu0 %vm111_vm1, %v89_v5  ;;  %v964_v45 = vld [vmem:[#allocation6 + $0xc0] sm:$0xff]   ;;  %v965_v46 = vld [vmem:[#allocation6 + $0xc8] sm:$0xff]   ;;  %v966_v47 = vld [vmem:[#allocation6 + $0xd0] sm:$0xff]  }
  0x63   :  { %865 = vmatprep.mubr.msk.bf16.mxu0 %vm1104_vm0, %v1103_v0  ;;  %834 = vmatpush3.bf16.msra.mxu1 %v942_v7  ;;  %v967_v48 = vld [vmem:[#allocation6 + $0xd8] sm:$0xff]   ;;  %v968_v49 = vld [vmem:[#allocation6 + $0xe0] sm:$0xff]   ;;  %v969_v50 = vld [vmem:[#allocation6 + $0xe8] sm:$0xff]  }
  0x64   :  { %835 = vmatprep.subr.bf16.mxu1 %v1103_v0  ;;  %850 = vmatpush3.bf16.msra.mxu0 %v948_v13  ;;  %v737_v51 = vld [vmem:[#allocation7 + $0x2] ss:$0 sm:$0xff]  ;;  %v970_v59 = vld [vmem:[#allocation6 + $0xf0] sm:$0xff]   ;;  %v971_v60 = vld [vmem:[#allocation6 + $0xf8] sm:$0xff]  }
  0x65   :  { %851 = vmatprep.subr.bf16.mxu0 %v1103_v0  ;;  %v972_v61 = vld [vmem:[#allocation9] sm:$0xff]   ;;  %v973_v62 = vld [vmem:[#allocation9 + $0x8] sm:$0xff]   ;;  %v974_v63 = vld [vmem:[#allocation9 + $0x10] sm:$0xff]  }
  0x66   :  { %v975_v1 = vld [vmem:[#allocation9 + $0x18] sm:$0xff]   ;;  %v976_v2 = vld [vmem:[#allocation9 + $0x20] sm:$0xff]   ;;  %v977_v3 = vld [vmem:[#allocation9 + $0x28] sm:$0xff]  }
  0x67   :  { %836 = vmatpush3.bf16.msra.mxu1 %v943_v8  ;;  %v746_v4 = vld [vmem:[#allocation7 + $0x3] ss:$0 sm:$0xff] }
  0x68   :  { %837 = vmatprep.subr.bf16.mxu1 %v1103_v0  ;;  %852 = vmatpush3.bf16.msra.mxu0 %v949_v14  ;;  %v979_v13 = vld [vmem:[#allocation9 + $0x38] sm:$0xff]  }
  0x69   :  { %853 = vmatprep.subr.bf16.mxu0 %v1103_v0  ;;  %v755_v14 = vld [vmem:[#allocation7 + $0x4] ss:$0 sm:$0xff] }
  0x6b   :  { %838 = vmatpush3.bf16.msra.mxu1 %v944_v9 }
  0x6c   :  { %839 = vmatprep.subr.bf16.mxu1 %v1103_v0  ;;  %854 = vmatpush3.bf16.msra.mxu0 %v950_v15 }
  0x6d   :  { %855 = vmatprep.subr.bf16.mxu0 %v1103_v0 }
  0x6f   :  { %840 = vmatpush3.bf16.msra.mxu1 %v945_v10 }
  0x70   :  { %841 = vmatprep.subr.bf16.mxu1 %v1103_v0  ;;  %856 = vmatpush3.bf16.msra.mxu0 %v951_v16 }
  0x71   :  { %857 = vmatprep.subr.bf16.mxu0 %v1103_v0 }
  0x73   :  { %842 = vmatpush3.bf16.msra.mxu1 %v946_v11 }
  0x74   :  { %843 = vmatprep.subr.bf16.mxu1 %v1103_v0  ;;  %858 = vmatpush3.bf16.msra.mxu0 %v952_v17 }
  0x75   :  { %859 = vmatprep.subr.bf16.mxu0 %v1103_v0 }
  0x77   :  { %844 = vmatpush3.bf16.msra.mxu1 %v947_v12  ;;  %v978_v12 = vld [vmem:[#allocation9 + $0x30] sm:$0xff]  }
  0x78   :  { %869 = vmatprep.subr.bf16.mxu1 %v1103_v0  ;;  %860 = vmatpush3.bf16.msra.mxu0 %v953_v18 }
  0x79   :  { %861 = vmatprep.subr.bf16.mxu0 %v1103_v0 }
  0x7c   :  { %862 = vmatpush3.bf16.msra.mxu0 %v954_v27 }
  0x7d   :  { %863 = vmatprep.subr.bf16.mxu0 %v1103_v0 }
  0x80   :  { %864 = vmatpush3.bf16.msra.mxu0 %v955_v28 }
  0x81   :  { %889 = vmatprep.subr.bf16.mxu0 %v1103_v0 }
 0x135   :  { %v149_v20 = vpop.f32.mrb[0].mxu0 }
 0x136   :  { %v150_v21 = vadd.f32 %v724_v19, %v149_v20  ;;  %v827_v22 = vpop.f32.mrb[1].mxu0 }
 0x137   :  { %v152_v23 = vpop.f32.mrb[2].mxu0  ;;  %v764_v22 = vld [vmem:[%s1274_s5] ss:$0 sm:$0xff] }
 0x138   :  { %v155_v24 = vmax.f32 %v150_v21, 0.0  ;;  %v828_v25 = vpop.f32.mrb[3].mxu0 }
 0x13a   :  { %v156_v26 = vpack.c.bf16 %v155_v24, %v155_v24 }
 0x13c   :  { %846 = vmatmul.mubr.bf16.vlgmr.msra.gmra.mrb[0].mxu1 %v156_v26 }
 0x13d   :  { %885 = vmatprep.mubr.msk.bf16.mxu1 %vm1104_vm0, %v1103_v0  ;;  %870 = vmatpush3.bf16.msra.mxu1 %v956_v29 }
 0x13e   :  { %871 = vmatprep.subr.bf16.mxu1 %v1103_v0 }
 0x141   :  { %872 = vmatpush3.bf16.msra.mxu1 %v957_v30 }
 0x142   :  { %873 = vmatprep.subr.bf16.mxu1 %v1103_v0 }
 0x145   :  { %874 = vmatpush3.bf16.msra.mxu1 %v958_v31 }
 0x146   :  { %875 = vmatprep.subr.bf16.mxu1 %v1103_v0 }
 0x149   :  { %876 = vmatpush3.bf16.msra.mxu1 %v959_v32 }
 0x14a   :  { %877 = vmatprep.subr.bf16.mxu1 %v1103_v0 }
 0x14d   :  { %878 = vmatpush3.bf16.msra.mxu1 %v960_v33 }
 0x14e   :  { %879 = vmatprep.subr.bf16.mxu1 %v1103_v0 }
 0x151   :  { %880 = vmatpush3.bf16.msra.mxu1 %v961_v34 }
 0x152   :  { %881 = vmatprep.subr.bf16.mxu1 %v1103_v0 }
 0x155   :  { %882 = vmatpush3.bf16.msra.mxu1 %v962_v43 }
 0x156   :  { %883 = vmatprep.subr.bf16.mxu1 %v1103_v0 }
 0x159   :  { %884 = vmatpush3.bf16.msra.mxu1 %v963_v44 }
 0x15a   :  { %909 = vmatprep.subr.bf16.mxu1 %v1103_v0 }
 0x20f   :  { %v260_v36 = vpop.f32.mrb[0].mxu1 }
 0x210   :  { %v261_v37 = vadd.f32 %v728_v35, %v260_v36  ;;  %v847_v38 = vpop.f32.mrb[1].mxu1 }
 0x211   :  { %v263_v39 = vpop.f32.mrb[2].mxu1 }
 0x212   :  { %v266_v40 = vmax.f32 %v261_v37, 0.0  ;;  %v848_v41 = vpop.f32.mrb[3].mxu1 }
 0x214   :  { %v267_v42 = vpack.c.bf16 %v266_v40, %v266_v40 }
 0x216   :  { %866 = vmatmul.mubr.bf16.vlgmr.msra.gmra.mrb[4].mxu0 %v267_v42 }
 0x217   :  { %905 = vmatprep.mubr.msk.bf16.mxu0 %vm1104_vm0, %v1103_v0  ;;  %890 = vmatpush3.bf16.msra.mxu0 %v964_v45 }
 0x218   :  { %891 = vmatprep.subr.bf16.mxu0 %v1103_v0 }
 0x21b   :  { %892 = vmatpush3.bf16.msra.mxu0 %v965_v46 }
 0x21c   :  { %893 = vmatprep.subr.bf16.mxu0 %v1103_v0 }
 0x21f   :  { %894 = vmatpush3.bf16.msra.mxu0 %v966_v47 }
 0x220   :  { %895 = vmatprep.subr.bf16.mxu0 %v1103_v0 }
 0x223   :  { %896 = vmatpush3.bf16.msra.mxu0 %v967_v48 }
 0x224   :  { %897 = vmatprep.subr.bf16.mxu0 %v1103_v0 }
 0x227   :  { %898 = vmatpush3.bf16.msra.mxu0 %v968_v49 }
 0x228   :  { %899 = vmatprep.subr.bf16.mxu0 %v1103_v0 }
 0x22b   :  { %900 = vmatpush3.bf16.msra.mxu0 %v969_v50 }
 0x22c   :  { %901 = vmatprep.subr.bf16.mxu0 %v1103_v0 }
 0x22f   :  { %902 = vmatpush3.bf16.msra.mxu0 %v970_v59 }
 0x230   :  { %903 = vmatprep.subr.bf16.mxu0 %v1103_v0 }
 0x233   :  { %904 = vmatpush3.bf16.msra.mxu0 %v971_v60 }
 0x2e9   :  { %v372_v52 = vpop.f32.mrb[4].mxu0 }
 0x2ea   :  { %v373_v53 = vadd.f32 %v737_v51, %v372_v52  ;;  %v867_v54 = vpop.f32.mrb[5].mxu0 }
 0x2eb   :  { %v375_v55 = vpop.f32.mrb[6].mxu0 }
 0x2ec   :  { %v378_v56 = vmax.f32 %v373_v53, 0.0  ;;  %v868_v57 = vpop.f32.mrb[7].mxu0 }
 0x2ee   :  { %v379_v58 = vpack.c.bf16 %v378_v56, %v378_v56 }
 0x2f0   :  { %886 = vmatmul.mubr.bf16.vlgmr.msra.gmra.mrb[4].mxu1 %v379_v58 }
 0x2f1   :  { %925 = vmatprep.mubr.msk.bf16.mxu1 %vm1104_vm0, %v1103_v0  ;;  %910 = vmatpush3.bf16.msra.mxu1 %v972_v61 }
 0x2f2   :  { %911 = vmatprep.subr.bf16.mxu1 %v1103_v0 }
 0x2f5   :  { %912 = vmatpush3.bf16.msra.mxu1 %v973_v62 }
 0x2f6   :  { %913 = vmatprep.subr.bf16.mxu1 %v1103_v0 }
 0x2f9   :  { %914 = vmatpush3.bf16.msra.mxu1 %v974_v63 }
 0x2fa   :  { %915 = vmatprep.subr.bf16.mxu1 %v1103_v0 }
 0x2fd   :  { %916 = vmatpush3.bf16.msra.mxu1 %v975_v1 }
 0x2fe   :  { %917 = vmatprep.subr.bf16.mxu1 %v1103_v0 }
 0x301   :  { %918 = vmatpush3.bf16.msra.mxu1 %v976_v2 }
 0x302   :  { %919 = vmatprep.subr.bf16.mxu1 %v1103_v0 }
 0x305   :  { %920 = vmatpush3.bf16.msra.mxu1 %v977_v3 }
 0x306   :  { %921 = vmatprep.subr.bf16.mxu1 %v1103_v0 }
 0x309   :  { %922 = vmatpush3.bf16.msra.mxu1 %v978_v12 }
 0x30a   :  { %923 = vmatprep.subr.bf16.mxu1 %v1103_v0 }
 0x30d   :  { %924 = vmatpush3.bf16.msra.mxu1 %v979_v13 }
 0x3c3   :  { %v484_v5 = vpop.f32.mrb[4].mxu1 }
 0x3c4   :  { %v485_v6 = vadd.f32 %v746_v4, %v484_v5  ;;  %v887_v7 = vpop.f32.mrb[5].mxu1 }
 0x3c5   :  { %v487_v8 = vpop.f32.mrb[6].mxu1 }
 0x3c6   :  { %v490_v9 = vmax.f32 %v485_v6, 0.0  ;;  %v888_v10 = vpop.f32.mrb[7].mxu1 }
 0x3c8   :  { %v491_v11 = vpack.c.bf16 %v490_v9, %v490_v9 }
 0x3ca   :  { %906 = vmatmul.mubr.bf16.vlgmr.msra.gmra.mrb[8].mxu0 %v491_v11 }
 0x49d   :  { %v596_v15 = vpop.f32.mrb[8].mxu0 }
 0x49e   :  { %v597_v16 = vadd.f32 %v755_v14, %v596_v15  ;;  %v907_v17 = vpop.f32.mrb[9].mxu0 }
 0x49f   :  { %v599_v18 = vpop.f32.mrb[10].mxu0 }
 0x4a0   :  { %v602_v19 = vmax.f32 %v597_v16, 0.0  ;;  %v908_v20 = vpop.f32.mrb[11].mxu0 }
 0x4a2   :  { %v603_v21 = vpack.c.bf16 %v602_v19, %v602_v19 }
 0x4a4   :  { %926 = vmatmul.mubr.bf16.vlgmr.msra.gmra.mrb[8].mxu1 %v603_v21 }
 0x577   :  { %v709_v23 = vpop.f32.mrb[8].mxu1 }
 0x578   :  { %v710_v24 = vadd.f32 %v764_v22, %v709_v23  ;;  %v927_v25 = vpop.f32.mrb[9].mxu1 }
 0x579   :  { %v712_v26 = vpop.f32.mrb[10].mxu1 }
 0x57a   :  { %v715_v0 = vpack.c.bf16 %v710_v24, %v710_v24  ;;  %v928_v27 = vpop.f32.mrb[11].mxu1 }
 0x57c   :  { %716 = vst [vmem:[%s1275_s6] sm:$0xf] %v715_v0 }
 0x57d   :  { %721 = vsyncpa [#allocation3], 1 }
 0x57e   :  { %722 = vsyncpa [#allocation5], 1 }
 0x57f   :  { %723 = vsyncpa [#allocation8], 1 }

</bundles_post_ra>
